<compile_context>
chip_gen: v5e
topology: v5e:2x2
jax: 0.10.0
libtpu: 0.0.40
codegen_flags: <defaults>
</compile_context>

<pallas_src>
import functools

import jax
import jax.numpy as jnp
import numpy as np
from jax import lax
from jax.experimental import pallas as pl
from jax.experimental.pallas import tpu as pltpu


_LN_EPS = 1e-5
_ROW_TILE = 512   # fixed row tile (multiple of 8); ragged tails via partial blocks


def _vmem_limit_bytes():
    """Per-generation VMEM limit (~75% of capacity), clamped to a safe range."""
    default = 64 * 1024 * 1024
    try:
        cap = int(pltpu.get_tpu_info().vmem_capacity_bytes)
    except Exception:
        return default
    return int(min(max(cap * 3 // 4, 32 * 1024 * 1024), 100 * 1024 * 1024))


def _layer_norm(x, gamma, beta, eps):
    mu = jnp.mean(x, axis=-1, keepdims=True)
    var = jnp.mean((x - mu) ** 2, axis=-1, keepdims=True)
    return (x - mu) * lax.rsqrt(var + eps) * gamma + beta


# ----------------------------- kernels ------------------------------------- #

def _qkv_kernel(x_ref, wq_ref, wk_ref, wv_ref, bq_ref, bk_ref, bv_ref,
                q_ref, k_ref, v_ref, *, scale):
    """Row tile of the Q/K/V projections (bf16 MXU operands, f32 accumulate).

    The softmax scale (dim_head ** -0.5) is folded into Q here so the attention
    kernel never has to scale the (L, L) score tile.
    """
    x = x_ref[...]                                                      # (TM, D) bf16
    q = jnp.dot(x, wq_ref[...], preferred_element_type=jnp.float32) + bq_ref[...]
    k = jnp.dot(x, wk_ref[...], preferred_element_type=jnp.float32) + bk_ref[...]
    v = jnp.dot(x, wv_ref[...], preferred_element_type=jnp.float32) + bv_ref[...]
    q_ref[...] = (q * scale).astype(q_ref.dtype)
    k_ref[...] = k.astype(k_ref.dtype)
    v_ref[...] = v.astype(v_ref.dtype)


def _attn_kernel(q_ref, k_ref, v_ref, o_ref):
    """Scaled dot-product attention for one pseudo-head (PyTorch-view semantics).

    Blocks are (1, L, Dh).  QK^T is a dot_general contracting the last dims
    (no materialized transpose); softmax math is f32 with exact division; Q
    arrives pre-scaled from the QKV kernel.
    """
    # TODO(synk): for long sequences, tile over the KV axis with an online
    # softmax (flash-style) instead of materializing the full (L, L) scores.
    q = q_ref[...]                                                      # (1, L, Dh) bf16
    k = k_ref[...]
    v = v_ref[...]
    s = lax.dot_general(q, k, (((2,), (2,)), ((0,), (0,))),
                        preferred_element_type=jnp.float32)             # (1, L, L)
    s = s - jnp.max(s, axis=-1, keepdims=True)
    p = jnp.exp(s)
    p = p / jnp.sum(p, axis=-1, keepdims=True)
    ctx = lax.dot_general(p.astype(v.dtype), v, (((2,), (1,)), ((0,), (0,))),
                          preferred_element_type=jnp.float32)           # (1, L, Dh)
    # TODO(synk): lane-dense (L, D) ctx store needs the in-kernel head-mixing
    # relayout; left as (1, L, Dh) masked stores for lowering safety.
    o_ref[...] = ctx.astype(o_ref.dtype)


def _out_ffn_kernel(ctx_ref, x_ref, wo_ref, bo_ref, g1_ref, be1_ref,
                    w1_ref, bf1_ref, w2_ref, bf2_ref, g2_ref, be2_ref,
                    y_ref, *, eps):
    """Row tile of: attention output projection + residual + LN, then FFN + residual + LN."""
    # TODO(synk): dropout is treated as identity (eval mode / p == 0.0).
    # TODO(synk): chunk the FFN hidden dimension when `hidden` is large (v7x VMEM).
    ctx = ctx_ref[...]                                                  # (TM, D) bf16
    out = jnp.dot(ctx, wo_ref[...], preferred_element_type=jnp.float32) + bo_ref[...]
    out = out + x_ref[...]                                              # residual in f32
    out = _layer_norm(out, g1_ref[...], be1_ref[...], eps)

    h = jnp.dot(out.astype(jnp.bfloat16), w1_ref[...],
                preferred_element_type=jnp.float32) + bf1_ref[...]
    h = jnp.maximum(h, 0.0)                                             # ReLU
    y = jnp.dot(h.astype(jnp.bfloat16), w2_ref[...],
                preferred_element_type=jnp.float32) + bf2_ref[...]
    y = y + out
    y_ref[...] = _layer_norm(y, g2_ref[...], be2_ref[...], eps).astype(y_ref.dtype)


# ----------------------------- wrapper -------------------------------------- #

def encoder_forward(x, params, num_head, *, row_tile=_ROW_TILE):
    B, L, D = x.shape
    H = num_head
    assert D % H == 0
    Dh = D // H
    BL = B * L
    hidden = params["w1"].shape[1]

    f32, bf16 = jnp.float32, jnp.bfloat16
    x_flat = x.reshape(BL, D).astype(f32)     # residual path (full precision)
    x_bf16 = x_flat.astype(bf16)              # MXU operand for the QKV kernel

    # Weights feed the MXU as bf16 (f32 accumulation inside the kernels);
    # biases / LayerNorm parameters stay f32.
    wq = params["wq"].astype(bf16)
    wk = params["wk"].astype(bf16)
    wv = params["wv"].astype(bf16)
    wo = params["wo"].astype(bf16)
    w1 = params["w1"].astype(bf16)
    w2 = params["w2"].astype(bf16)

    # Fixed row tile; Pallas partial trailing blocks handle ragged BL.
    tm = BL if BL <= row_tile else row_tile
    grid_rows = (pl.cdiv(BL, tm),)

    row_spec = pl.BlockSpec((tm, D), lambda i: (i, 0))

    def const2(shape):      # VMEM-resident operand (same block every grid step)
        # TODO(synk): pipeline_mode=pl.Buffered(1) would halve weight VMEM on v7x.
        return pl.BlockSpec(shape, lambda i: (0, 0))

    vmem_limit = _vmem_limit_bytes()
    row_params = pltpu.CompilerParams(
        dimension_semantics=("parallel",), vmem_limit_bytes=vmem_limit)

    # ---- fused Q/K/V projections, row-tiled over B*L ----
    scale = float(Dh) ** (-0.5)
    q, k, v = pl.pallas_call(
        functools.partial(_qkv_kernel, scale=scale),
        grid=grid_rows,
        in_specs=[row_spec,
                  const2((D, D)), const2((D, D)), const2((D, D)),
                  const2((1, D)), const2((1, D)), const2((1, D))],
        out_specs=[row_spec] * 3,
        out_shape=[jax.ShapeDtypeStruct((BL, D), bf16)] * 3,
        compiler_params=row_params,
    )(x_bf16, wq, wk, wv, params["bq"], params["bk"], params["bv"])

    # glue reshape == PyTorch `.view(batch*num_head, -1, dim_head)` on a
    # contiguous (B, L, D) tensor (flat row-major reinterpretation; free in XLA).
    qh = q.reshape(B * H, L, Dh)
    kh = k.reshape(B * H, L, Dh)
    vh = v.reshape(B * H, L, Dh)

    # ---- attention: one pseudo-head per grid step (B*H parallel steps) ----
    head_spec = pl.BlockSpec((1, L, Dh), lambda g: (g, 0, 0))
    ctx = pl.pallas_call(
        _attn_kernel,
        grid=(B * H,),
        in_specs=[head_spec, head_spec, head_spec],
        out_specs=head_spec,
        out_shape=jax.ShapeDtypeStruct((B * H, L, Dh), bf16),
        compiler_params=pltpu.CompilerParams(
            dimension_semantics=("parallel",), vmem_limit_bytes=vmem_limit),
    )(qh, kh, vh)

    # glue reshape == PyTorch `.view(batch, -1, dim_head * num_head)`
    ctx_flat = ctx.reshape(BL, D)

    # ---- output projection + residual + LN, then FFN + residual + LN ----
    y_flat = pl.pallas_call(
        functools.partial(_out_ffn_kernel, eps=_LN_EPS),
        grid=grid_rows,
        in_specs=[row_spec, row_spec,
                  const2((D, D)), const2((1, D)),
                  const2((1, D)), const2((1, D)),
                  const2((D, hidden)), const2((1, hidden)),
                  const2((hidden, D)), const2((1, D)),
                  const2((1, D)), const2((1, D))],
        out_specs=row_spec,
        out_shape=jax.ShapeDtypeStruct((BL, D), f32),
        compiler_params=row_params,
    )(ctx_flat, x_flat,
      wo, params["bo"], params["ln1_g"], params["ln1_b"],
      w1, params["bf1"], w2, params["bf2"],
      params["ln2_g"], params["ln2_b"])

    return y_flat.reshape(B, L, D)


# ----------------------- pure-JAX reference (for checking) ------------------ #

def encoder_reference(x, params, num_head):
    B, L, D = x.shape
    H = num_head
    Dh = D // H
    hp = {"precision": jax.lax.Precision.HIGHEST}

    def ln(v, g, b, eps=_LN_EPS):
        mu = jnp.mean(v, axis=-1, keepdims=True)
        var = jnp.mean((v - mu) ** 2, axis=-1, keepdims=True)
        return (v - mu) / jnp.sqrt(var + eps) * g + b

    q = jnp.dot(x, params["wq"], **hp) + params["bq"]
    k = jnp.dot(x, params["wk"], **hp) + params["bk"]
    v = jnp.dot(x, params["wv"], **hp) + params["bv"]
    q = q.reshape(B * H, L, Dh)
    k = k.reshape(B * H, L, Dh)
    v = v.reshape(B * H, L, Dh)
    scale = float(Dh) ** (-0.5)
    att = jnp.einsum("bqd,bkd->bqk", q, k, **hp) * scale
    att = jax.nn.softmax(att, axis=-1)
    ctx = jnp.einsum("bqk,bkd->bqd", att, v, **hp).reshape(B, L, D)
    out = jnp.dot(ctx, params["wo"], **hp) + params["bo"]
    out = ln(out + x, params["ln1_g"], params["ln1_b"])
    h = jax.nn.relu(jnp.dot(out, params["w1"], **hp) + params["bf1"])
    y = jnp.dot(h, params["w2"], **hp) + params["bf2"]
    return ln(y + out, params["ln2_g"], params["ln2_b"])


# ----------------------------- main ----------------------------------------- #

if __name__ == "__main__":
    B, L = 2, 8
    dim_model, num_head, hidden = 32, 4, 64

    key = jax.random.PRNGKey(0)
    keys = jax.random.split(key, 12)

    def init(k, shape, fan_in):
        bound = 1.0 / np.sqrt(fan_in)
        return jax.random.uniform(k, shape, jnp.float32, -bound, bound)

    # weights stored as (in, out) so that y = x @ W + b
    params = {
        "wq": init(keys[0], (dim_model, dim_model), dim_model),
        "bq": init(keys[1], (1, dim_model), dim_model),
        "wk": init(keys[2], (dim_model, dim_model), dim_model),
        "bk": init(keys[3], (1, dim_model), dim_model),
        "wv": init(keys[4], (dim_model, dim_model), dim_model),
        "bv": init(keys[5], (1, dim_model), dim_model),
        "wo": init(keys[6], (dim_model, dim_model), dim_model),
        "bo": init(keys[7], (1, dim_model), dim_model),
        "ln1_g": jnp.ones((1, dim_model), jnp.float32),
        "ln1_b": jnp.zeros((1, dim_model), jnp.float32),
        "w1": init(keys[8], (dim_model, hidden), dim_model),
        "bf1": init(keys[9], (1, hidden), dim_model),
        "w2": init(keys[10], (hidden, dim_model), hidden),
        "bf2": init(keys[11], (1, dim_model), hidden),
        "ln2_g": jnp.ones((1, dim_model), jnp.float32),
        "ln2_b": jnp.zeros((1, dim_model), jnp.float32),
    }

    x = jax.random.normal(jax.random.PRNGKey(42), (B, L, dim_model), jnp.float32)

    out = encoder_forward(x, params, num_head)
    out = jax.block_until_ready(out)

    ref = encoder_reference(x, params, num_head)
    # bf16 MXU operands (f32 accumulation) vs. f32-HIGHEST reference.
    np.testing.assert_allclose(np.asarray(out), np.asarray(ref),
                               rtol=3e-2, atol=3e-2)

    print("KERNEL_OK")
</pallas_src>

<mosaic_0001>
module attributes {stable_mosaic.version = 11 : i64} {
  func.func @_qkv_kernel(%arg0: i32, %arg1: memref<16x32xbf16, #tpu.memory_space<vmem>>, %arg2: memref<32x32xbf16, #tpu.memory_space<vmem>>, %arg3: memref<32x32xbf16, #tpu.memory_space<vmem>>, %arg4: memref<32x32xbf16, #tpu.memory_space<vmem>>, %arg5: memref<1x32xf32, #tpu.memory_space<vmem>>, %arg6: memref<1x32xf32, #tpu.memory_space<vmem>>, %arg7: memref<1x32xf32, #tpu.memory_space<vmem>>, %arg8: memref<16x32xbf16, #tpu.memory_space<vmem>>, %arg9: memref<16x32xbf16, #tpu.memory_space<vmem>>, %arg10: memref<16x32xbf16, #tpu.memory_space<vmem>>) attributes {dimension_semantics = [#tpu.dimension_semantics<parallel>], iteration_bounds = array<i64: 1>, scalar_prefetch = 0 : i64, scratch_operands = 0 : i64, tpu.core_type = #tpu.core_type<tc>, window_params = [{transform_indices = @transform_0, window_bounds = array<i64: 16, 32>}, {pipeline_mode = #tpu.pipeline_mode<synchronous>, transform_indices = @transform_1, window_bounds = array<i64: 32, 32>}, {pipeline_mode = #tpu.pipeline_mode<synchronous>, transform_indices = @transform_2, window_bounds = array<i64: 32, 32>}, {pipeline_mode = #tpu.pipeline_mode<synchronous>, transform_indices = @transform_3, window_bounds = array<i64: 32, 32>}, {pipeline_mode = #tpu.pipeline_mode<synchronous>, transform_indices = @transform_4, window_bounds = array<i64: 1, 32>}, {pipeline_mode = #tpu.pipeline_mode<synchronous>, transform_indices = @transform_5, window_bounds = array<i64: 1, 32>}, {pipeline_mode = #tpu.pipeline_mode<synchronous>, transform_indices = @transform_6, window_bounds = array<i64: 1, 32>}, {transform_indices = @transform_7, window_bounds = array<i64: 16, 32>}, {transform_indices = @transform_8, window_bounds = array<i64: 16, 32>}, {transform_indices = @transform_9, window_bounds = array<i64: 16, 32>}]} {
    %c0 = arith.constant 0 : index
    %c0_0 = arith.constant 0 : index
    %0 = vector.load %arg1[%c0, %c0_0] : memref<16x32xbf16, #tpu.memory_space<vmem>>, vector<16x32xbf16>
    %c0_1 = arith.constant 0 : index
    %c0_2 = arith.constant 0 : index
    %1 = vector.load %arg2[%c0_1, %c0_2] : memref<32x32xbf16, #tpu.memory_space<vmem>>, vector<32x32xbf16>
    %cst = arith.constant dense<0.000000e+00> : vector<16x32xf32>
    %2 = tpu.matmul %0, %1, %cst {dimension_numbers = #tpu.dot_dimension_numbers<[1], [0], [0], [1], [0, 0, 1, 1], [], []>} : vector<16x32xbf16>, vector<32x32xbf16>, vector<16x32xf32> -> vector<16x32xf32>
    %c0_3 = arith.constant 0 : index
    %c0_4 = arith.constant 0 : index
    %3 = vector.load %arg5[%c0_3, %c0_4] : memref<1x32xf32, #tpu.memory_space<vmem>>, vector<1x32xf32>
    %4 = vector.broadcast %3 : vector<1x32xf32> to vector<16x32xf32>
    %5 = arith.addf %2, %4 : vector<16x32xf32>
    %c0_5 = arith.constant 0 : index
    %c0_6 = arith.constant 0 : index
    %6 = vector.load %arg3[%c0_5, %c0_6] : memref<32x32xbf16, #tpu.memory_space<vmem>>, vector<32x32xbf16>
    %cst_7 = arith.constant dense<0.000000e+00> : vector<16x32xf32>
    %7 = tpu.matmul %0, %6, %cst_7 {dimension_numbers = #tpu.dot_dimension_numbers<[1], [0], [0], [1], [0, 0, 1, 1], [], []>} : vector<16x32xbf16>, vector<32x32xbf16>, vector<16x32xf32> -> vector<16x32xf32>
    %c0_8 = arith.constant 0 : index
    %c0_9 = arith.constant 0 : index
    %8 = vector.load %arg6[%c0_8, %c0_9] : memref<1x32xf32, #tpu.memory_space<vmem>>, vector<1x32xf32>
    %9 = vector.broadcast %8 : vector<1x32xf32> to vector<16x32xf32>
    %10 = arith.addf %7, %9 : vector<16x32xf32>
    %c0_10 = arith.constant 0 : index
    %c0_11 = arith.constant 0 : index
    %11 = vector.load %arg4[%c0_10, %c0_11] : memref<32x32xbf16, #tpu.memory_space<vmem>>, vector<32x32xbf16>
    %cst_12 = arith.constant dense<0.000000e+00> : vector<16x32xf32>
    %12 = tpu.matmul %0, %11, %cst_12 {dimension_numbers = #tpu.dot_dimension_numbers<[1], [0], [0], [1], [0, 0, 1, 1], [], []>} : vector<16x32xbf16>, vector<32x32xbf16>, vector<16x32xf32> -> vector<16x32xf32>
    %c0_13 = arith.constant 0 : index
    %c0_14 = arith.constant 0 : index
    %13 = vector.load %arg7[%c0_13, %c0_14] : memref<1x32xf32, #tpu.memory_space<vmem>>, vector<1x32xf32>
    %14 = vector.broadcast %13 : vector<1x32xf32> to vector<16x32xf32>
    %15 = arith.addf %12, %14 : vector<16x32xf32>
    %cst_15 = arith.constant 0.353553385 : f32
    %16 = vector.broadcast %cst_15 : f32 to vector<16x32xf32>
    %17 = arith.mulf %5, %16 : vector<16x32xf32>
    %18 = arith.truncf %17 : vector<16x32xf32> to vector<16x32xbf16>
    %c0_16 = arith.constant 0 : index
    %c0_17 = arith.constant 0 : index
    %19 = vector.load %arg8[%c0_16, %c0_17] : memref<16x32xbf16, #tpu.memory_space<vmem>>, vector<16x32xbf16>
    tpu.vector_store %arg8[%c0_16, %c0_17], %18 {strides = array<i32>} : memref<16x32xbf16, #tpu.memory_space<vmem>>, vector<16x32xbf16>,
    %20 = arith.truncf %10 : vector<16x32xf32> to vector<16x32xbf16>
    %c0_18 = arith.constant 0 : index
    %c0_19 = arith.constant 0 : index
    %21 = vector.load %arg9[%c0_18, %c0_19] : memref<16x32xbf16, #tpu.memory_space<vmem>>, vector<16x32xbf16>
    tpu.vector_store %arg9[%c0_18, %c0_19], %20 {strides = array<i32>} : memref<16x32xbf16, #tpu.memory_space<vmem>>, vector<16x32xbf16>,
    %22 = arith.truncf %15 : vector<16x32xf32> to vector<16x32xbf16>
    %c0_20 = arith.constant 0 : index
    %c0_21 = arith.constant 0 : index
    %23 = vector.load %arg10[%c0_20, %c0_21] : memref<16x32xbf16, #tpu.memory_space<vmem>>, vector<16x32xbf16>
    tpu.vector_store %arg10[%c0_20, %c0_21], %22 {strides = array<i32>} : memref<16x32xbf16, #tpu.memory_space<vmem>>, vector<16x32xbf16>,
    return
  }
  func.func @transform_0(%arg0: i32) -> (i32, i32) {
    %c0_i32 = arith.constant 0 : i32
    %c0_i32_0 = arith.constant 0 : i32
    return %arg0, %c0_i32 : i32, i32
  }
  func.func @transform_1(%arg0: i32) -> (i32, i32) {
    %c0_i32 = arith.constant 0 : i32
    %c0_i32_0 = arith.constant 0 : i32
    %c0_i32_1 = arith.constant 0 : i32
    return %c0_i32, %c0_i32_0 : i32, i32
  }
  func.func @transform_2(%arg0: i32) -> (i32, i32) {
    %c0_i32 = arith.constant 0 : i32
    %c0_i32_0 = arith.constant 0 : i32
    %c0_i32_1 = arith.constant 0 : i32
    return %c0_i32, %c0_i32_0 : i32, i32
  }
  func.func @transform_3(%arg0: i32) -> (i32, i32) {
    %c0_i32 = arith.constant 0 : i32
    %c0_i32_0 = arith.constant 0 : i32
    %c0_i32_1 = arith.constant 0 : i32
    return %c0_i32, %c0_i32_0 : i32, i32
  }
  func.func @transform_4(%arg0: i32) -> (i32, i32) {
    %c0_i32 = arith.constant 0 : i32
    %c0_i32_0 = arith.constant 0 : i32
    %c0_i32_1 = arith.constant 0 : i32
    return %c0_i32, %c0_i32_0 : i32, i32
  }
  func.func @transform_5(%arg0: i32) -> (i32, i32) {
    %c0_i32 = arith.constant 0 : i32
    %c0_i32_0 = arith.constant 0 : i32
    %c0_i32_1 = arith.constant 0 : i32
    return %c0_i32, %c0_i32_0 : i32, i32
  }
  func.func @transform_6(%arg0: i32) -> (i32, i32) {
    %c0_i32 = arith.constant 0 : i32
    %c0_i32_0 = arith.constant 0 : i32
    %c0_i32_1 = arith.constant 0 : i32
    return %c0_i32, %c0_i32_0 : i32, i32
  }
  func.func @transform_7(%arg0: i32) -> (i32, i32) {
    %c0_i32 = arith.constant 0 : i32
    %c0_i32_0 = arith.constant 0 : i32
    return %arg0, %c0_i32 : i32, i32
  }
  func.func @transform_8(%arg0: i32) -> (i32, i32) {
    %c0_i32 = arith.constant 0 : i32
    %c0_i32_0 = arith.constant 0 : i32
    return %arg0, %c0_i32 : i32, i32
  }
  func.func @transform_9(%arg0: i32) -> (i32, i32) {
    %c0_i32 = arith.constant 0 : i32
    %c0_i32_0 = arith.constant 0 : i32
    return %arg0, %c0_i32 : i32, i32
  }
}

</mosaic_0001>

<bundles_post_ra>
// kernel: tpu_custom_call.1
= control target key start
LH: loop header
LB: loop body
LE: loop exit
PB: predicated region body
PF: predicated region fallthrough
CT: control target
= control target key end

     0   :  { %15 = vsyncpa [#allocation3], 0  ;;  %s623_s0 = inlined_call_operand.hbm [shape: bf16[16,32], index: 0, kind: input, shape index: {}]   ;;  %s624_s1 = inlined_call_operand.hbm [shape: bf16[32,32], index: 1, kind: input, shape index: {}]   ;;  %s625_s2 = inlined_call_operand.hbm [shape: bf16[32,32], index: 2, kind: input, shape index: {}]   ;;  %s626_s3 = inlined_call_operand.hbm [shape: bf16[32,32], index: 3, kind: input, shape index: {}]   ;;  %s627_s4 = inlined_call_operand.vmem [shape: f32[1,32], index: 4, kind: input, shape index: {}]   ;;  %s628_s5 = inlined_call_operand.vmem [shape: f32[1,32], index: 5, kind: input, shape index: {}]   ;;  %s629_s6 = inlined_call_operand.vmem [shape: f32[1,32], index: 6, kind: input, shape index: {}]   ;;  %s630_s7 = inlined_call_operand.hbm [shape: bf16[16,32], index: 7, kind: output, shape index: {0}]   ;;  %s631_s8 = inlined_call_operand.hbm [shape: bf16[16,32], index: 8, kind: output, shape index: {1}]   ;;  %s632_s9 = inlined_call_operand.hbm [shape: bf16[16,32], index: 9, kind: output, shape index: {2}]  }
   0x1   :  { %16 = vsyncpa [#allocation6], 0 }
   0x2   :  { %17 = vsyncpa [#allocation9], 0 }
   0x3   :  { %18 = vsyncpa [#allocation4], 0 }
   0x4   :  { %19 = vsyncpa [#allocation12], 0  ;;  %s37_s11 = sshll.u32 %s624_s1, 4  ;;  %s507_s12 = smov [#allocation5]   ;;  %s38_s11 = int_to_ptr.hbm [resolvable:$true] %s37_s11 }
   0x5   :  { %s39_s13 = sshll.u32 %s507_s12, 4  ;;  %s24_s16 = sshll.u32 %s623_s0, 4  ;;  %s40_s13 = int_to_ptr.vmem [resolvable:$true] %s39_s13  ;;  %s25_s16 = int_to_ptr.hbm [resolvable:$true] %s24_s16 }
   0x6   :  { %s508_s17 = smov 64   ;;  %s509_s18 = smov 4  }
   0x7   :  { %45 = dma.hbm_to_vmem [thread:$0]  %s38_s11, 256, %s40_s13, [#allocation6], %s508_s17, %s508_s17, %s509_s18  }
   0x8   :  { %s510_s19 = smov [#allocation2]   ;;  %s50_s1 = sshll.u32 %s625_s2, 4  ;;  %s51_s1 = int_to_ptr.hbm [resolvable:$true] %s50_s1 }
   0x9   :  { %s26_s20 = sshll.u32 %s510_s19, 4  ;;  %s63_s24 = sshll.u32 %s626_s3, 4  ;;  %s27_s20 = int_to_ptr.vmem [resolvable:$true] %s26_s20  ;;  %s64_s24 = int_to_ptr.hbm [resolvable:$true] %s63_s24 }
   0xa   :  { %32 = dma.hbm_to_vmem [thread:$0]  %s25_s16, 128, %s27_s20, [#allocation3], %s508_s17, %s508_s17, %s509_s18  }
   0xb   :  { %s511_s25 = smov [#allocation7]   ;;  %s512_s27 = smov [#allocation8]  }
   0xc   :  { %s52_s26 = sshll.u32 %s511_s25, 4  ;;  %s65_s2 = sshll.u32 %s512_s27, 4  ;;  %s53_s26 = int_to_ptr.vmem [resolvable:$true] %s52_s26  ;;  %s66_s2 = int_to_ptr.vmem [resolvable:$true] %s65_s2 }
   0xd   :  { %58 = dma.hbm_to_vmem [thread:$0]  %s51_s1, 256, %s53_s26, [#allocation6], %s508_s17, %s508_s17, %s509_s18  }
   0xe   :  { %71 = dma.hbm_to_vmem [thread:$0]  %s64_s24, 256, %s66_s2, [#allocation9], %s508_s17, %s508_s17, %s509_s18  }
   0xf   :  { %497 = dma.done.wait [#allocation3], 128  }
  0x10   :  { %498 = vsyncadd [#allocation3], 4294967168 }
  0x11   :  { %499 = dma.done.wait [#allocation6], 512  }
  0x12   :  { %500 = vsyncadd [#allocation6], 4294966784 }
  0x13   :  { %501 = dma.done.wait [#allocation9], 256  }
  0x14   :  { %502 = vsyncadd [#allocation9], 4294967040  ;;  %v312_v0 = vld [vmem:[#allocation5 + $0x8] sm:$0xff]  ;;  %v314_v1 = vld [vmem:[#allocation7 + $0x8] sm:$0xff]  ;;  %vm122_vm0 = vcmask 261120   ;;  %vm212_vm1 = vcmask 257024  }
  0x15   :  { %v316_v2 = vld [vmem:[#allocation8 + $0x8] sm:$0xff]  ;;  %132 = vmatpush.bf16.msra.mxu0 %v312_v0  ;;  %166 = vmatpush.bf16.msra.mxu1 %v314_v1  ;;  %v311_v3 = vld [vmem:[#allocation5] sm:$0xff]  ;;  %v313_v4 = vld [vmem:[#allocation7] sm:$0xff]  ;;  %s242_s14 = sshll.u32 %s631_s8, 4  ;;  %s514_s15 = smov [#allocation10]   ;;  %s243_s14 = int_to_ptr.hbm [resolvable:$true] %s242_s14 }
  0x16   :  { %200 = vmatpush.bf16.msra.mxu2 %v316_v2  ;;  %v315_v5 = vld [vmem:[#allocation8] sm:$0xff]  ;;  %v310_v6 = vld [vmem:[#allocation2] sm:$0xff]  ;;  %s229_s20 = sshll.u32 %s630_s7, 4  ;;  %s515_s8 = smov [#allocation13]   ;;  %s230_s20 = int_to_ptr.hbm [resolvable:$true] %s229_s20 }
  0x17   :  { %v326_v7 = vld [vmem:[%s627_s4] ss:$0 sm:$0xff]  ;;  %s513_s4 = smov [#allocation11]   ;;  %s253_s7 = sshll.u32 %s515_s8, 4  ;;  %s254_s7 = int_to_ptr.vmem [resolvable:$true] %s253_s7 }
  0x18   :  { %v327_v8 = vld [vmem:[%s628_s5] ss:$0 sm:$0xff]  ;;  %s240_s5 = sshll.u32 %s513_s4, 4  ;;  %s255_s1 = sshll.u32 %s632_s9, 4  ;;  %s241_s5 = int_to_ptr.vmem [resolvable:$true] %s240_s5  ;;  %s256_s1 = int_to_ptr.hbm [resolvable:$true] %s255_s1 }
  0x19   :  { %133 = vmatpush.bf16.msra.mxu0 %v311_v3  ;;  %167 = vmatpush.bf16.msra.mxu1 %v313_v4  ;;  %v328_v15 = vld [vmem:[%s629_s6] ss:$0 sm:$0xff]  ;;  %s227_s6 = sshll.u32 %s514_s15, 4  ;;  %s228_s6 = int_to_ptr.vmem [resolvable:$true] %s227_s6 }
  0x1a   :  { %201 = vmatpush.bf16.msra.mxu2 %v315_v5 }
  0x1c   :  { %291 = vmatmul.msk.bf16.vlgmr.msra.gmra.mxu0 %vm122_vm0, %v310_v6  ;;  %300 = vmatmul.msk.bf16.vlgmr.msra.gmra.mxu1 %vm122_vm0, %v310_v6 }
  0x1d   :  { %309 = vmatmul.msk.bf16.vlgmr.msra.gmra.mxu2 %vm122_vm0, %v310_v6 }
  0x99   :  { %v135_v9 = vpop.f32.mrf.mxu0  ;;  %v169_v10 = vpop.f32.mrf.mxu1 }
  0x9a   :  { %v136_v11 = vadd.f32 %v326_v7, %v135_v9  ;;  %v170_v12 = vadd.f32 %v327_v8, %v169_v10 }
  0x9c   :  { %v208_v13 = vmul.f32 0.35355338, %v136_v11  ;;  %v215_v14 = vpack.c.bf16 %v170_v12, %v170_v12 }
  0x9e   :  { %v210_v16 = vpack.c.bf16 %v208_v13, %v208_v13  ;;  %217 = vst.msk [vmem:[#allocation11] sm:$0xf] %vm212_vm1, %v215_v14 }
  0xa0   :  { %213 = vst.msk [vmem:[#allocation10] sm:$0xf] %vm212_vm1, %v210_v16  ;;  %v203_v17 = vpop.f32.mrf.mxu2 }
  0xa1   :  { %v204_v18 = vadd.f32 %v328_v15, %v203_v17  ;;  %v137_v19 = vpop.f32.mrf.mxu0  ;;  %v171_v20 = vpop.f32.mrf.mxu1 }
  0xa2   :  { %v138_v21 = vadd.f32 %v326_v7, %v137_v19  ;;  %v172_v22 = vadd.f32 %v327_v8, %v171_v20 }
  0xa3   :  { %v219_v23 = vpack.c.bf16 %v204_v18, %v204_v18 }
  0xa4   :  { %v209_v24 = vmul.f32 0.35355338, %v138_v21  ;;  %v216_v25 = vpack.c.bf16 %v172_v22, %v172_v22 }
  0xa5   :  { %221 = vst.msk [vmem:[#allocation13] sm:$0xf] %vm212_vm1, %v219_v23 }
  0xa6   :  { %v211_v26 = vpack.c.bf16 %v209_v24, %v209_v24  ;;  %218 = vst.msk [vmem:[#allocation11 + $0x4] sm:$0xf] %vm212_vm1, %v216_v25 }
  0xa7   :  { %248 = dma.vmem_to_hbm [thread:$0]  %s241_s5, 128, %s243_s14, [#allocation12], %s508_s17, %s508_s17, %s509_s18  }
  0xa8   :  { %214 = vst.msk [vmem:[#allocation10 + $0x4] sm:$0xf] %vm212_vm1, %v211_v26  ;;  %v205_v27 = vpop.f32.mrf.mxu2 }
  0xa9   :  { %v206_v28 = vadd.f32 %v328_v15, %v205_v27  ;;  %235 = dma.vmem_to_hbm [thread:$0]  %s228_s6, 128, %s230_s20, [#allocation4], %s508_s17, %s508_s17, %s509_s18  }
  0xab   :  { %v220_v29 = vpack.c.bf16 %v206_v28, %v206_v28 }
  0xad   :  { %222 = vst.msk [vmem:[#allocation13 + $0x4] sm:$0xf] %vm212_vm1, %v220_v29 }
  0xae   :  { %261 = dma.vmem_to_hbm [thread:$0]  %s254_s7, 128, %s256_s1, [#allocation12], %s508_s17, %s508_s17, %s509_s18  }
  0xaf   :  { %503 = dma.done.wait [#allocation4], 128  }
  0xb0   :  { %504 = vsyncadd [#allocation4], 4294967168 }
  0xb1   :  { %505 = dma.done.wait [#allocation12], 256  }
  0xb2   :  { %506 = vsyncadd [#allocation12], 4294967040 }
  0xb3   :  { %274 = vsyncpa [#allocation3], 1 }
  0xb4   :  { %275 = vsyncpa [#allocation6], 1 }
  0xb5   :  { %276 = vsyncpa [#allocation9], 1 }
  0xb6   :  { %277 = vsyncpa [#allocation4], 1 }
  0xb7   :  { %278 = vsyncpa [#allocation12], 1 }

</bundles_post_ra>
